<compile_context>
chip_gen: v5e
topology: v5e:2x2
jax: 0.10.0
libtpu: 0.0.40
codegen_flags: <defaults>
</compile_context>

<pallas_src>
import functools
import math

import jax
import jax.numpy as jnp
from jax.experimental import pallas as pl
from jax.experimental.pallas import tpu as pltpu


def down_layer_kernel(x_ref, w_ref, b_ref, h_ref, w_id_ref, o_ref, *, Hp, Wp):
    """One batch-tile of DownLayer.

    x_ref:    (2, 2, Cp, Mb)  2x2 pool window unfolded in the two leading dims;
                              channels (padded to a multiple of 8) on sublanes,
                              flattened (image, h, w) on lanes.
    w_ref:    (Cout, 9*Cp)    transposed conv weight, tap-major / channel-minor.
    b_ref:    (Cout, 1)       bias as a column (broadcasts over lanes).
    h_ref:    (1, Mb) int32   per-lane h coordinate (pattern is per-image periodic).
    w_id_ref: (1, Mb) int32   per-lane w coordinate.
    o_ref:    (Cout, Mb)      transposed output tile (lane-dense stores).
    """
    Mb = x_ref.shape[-1]

    # ---- 2x2 max pool (stride 2): elementwise max over the unfolded window (VPU).
    pooled = jnp.maximum(jnp.maximum(x_ref[0, 0], x_ref[0, 1]),
                         jnp.maximum(x_ref[1, 0], x_ref[1, 1]))        # (Cp, Mb)

    hh = h_ref[...]                                                    # (1, Mb)
    ww = w_id_ref[...]                                                 # (1, Mb)

    # ---- in-register im2col: 9 shifted taps via lane rotation + edge masks.
    # (pltpu.roll follows jnp.roll semantics; no VMEM scratch round trip.)
    taps = []
    for dy in (-1, 0, 1):
        for dx in (-1, 0, 1):
            s = dy * Wp + dx                       # flat-lane offset of this tap
            t = pooled if s == 0 else pltpu.roll(pooled, shift=(-s) % Mb, axis=1)
            if dy == 0 and dx == 0:
                taps.append(t)
            else:
                valid = ((hh + dy >= 0) & (hh + dy < Hp) &
                         (ww + dx >= 0) & (ww + dx < Wp))              # 'same' zero pad
                taps.append(jnp.where(valid, t, jnp.zeros_like(t)))
    col_t = jnp.concatenate(taps, axis=0)          # (9*Cp, Mb), aligned sublane groups

    # ---- single fused matmul, transposed so the output is M-on-lanes.
    acc_t = jnp.dot(w_ref[...], col_t, preferred_element_type=jnp.float32)  # (Cout, Mb)

    # ---- bias + ReLU in f32, one unmasked lane-dense store.
    out_t = jnp.maximum(acc_t + b_ref[...].astype(jnp.float32), 0.0)
    o_ref[...] = out_t.astype(o_ref.dtype)


def _images_per_step(n, hw, target_rows=1024):
    """Images per grid step.  Per-step rows (= nb*hw, matmul N / lane dim) are a
    multiple of 128 (unmasked stores, dense vregs) and pushed toward the
    512-2048 range; the batch is padded to whole steps instead of silently
    degrading to 1 image/step for awkward N.  Returns (nb, n_padded)."""
    step = 128 // math.gcd(hw, 128)            # smallest nb with nb*hw % 128 == 0
    if step * hw > 16384:                      # degenerate spatial size: one big step
        return n, n
    granules_needed = -(-n // step)
    granules = min(max(1, target_rows // (step * hw)), granules_needed)
    # v7x has 2 TensorCores: prefer >=2 grid steps over one merged step when each
    # step still carries >=256 lane rows (harmless on single-core v5e/v6e).
    if (granules == granules_needed and granules_needed >= 2
            and (granules_needed // 2) * step * hw >= 256):
        granules = granules_needed // 2
    nb = granules * step
    n_pad = -(-n // nb) * nb
    return nb, n_pad


def down_layer(x_nchw, weight_hwio, bias, *, compute_dtype=None, target_rows=1024):
    """DownLayer forward. x_nchw: (N, Cin, H, W); weight_hwio: (3,3,Cin,Cout); bias: (Cout,)."""
    N, Cin, H, W = x_nchw.shape
    KH, KW, _, Cout = weight_hwio.shape
    out_dtype = x_nchw.dtype

    # MaxPool2d(2,2) floors odd spatial sizes: crop to even (matches PyTorch).
    Hp, Wp = H // 2, W // 2
    x_nchw = x_nchw[:, :, :2 * Hp, :2 * Wp]
    hw = Hp * Wp

    nb, n_pad = _images_per_step(N, hw, target_rows)
    if n_pad != N:
        x_nchw = jnp.pad(x_nchw, ((0, n_pad - N), (0, 0), (0, 0), (0, 0)))

    # Channels padded up to a multiple of 8: every im2col tap becomes a whole
    # sublane group (the VMEM block is padded to 8 sublanes regardless).
    Cp = -(-Cin // 8) * 8
    if Cp != Cin:
        x_nchw = jnp.pad(x_nchw, ((0, 0), (0, Cp - Cin), (0, 0), (0, 0)))
        weight_hwio = jnp.pad(weight_hwio, ((0, 0), (0, 0), (0, Cp - Cin), (0, 0)))

    # Single fused relayout (one XLA pass): unfold the 2x2 pool window to the two
    # leading dims, channels to sublanes, flattened (n, h, w) to lanes.
    xk = (x_nchw.reshape(n_pad, Cp, Hp, 2, Wp, 2)
                 .transpose(3, 5, 1, 0, 2, 4)              # (2, 2, Cp, n_pad, Hp, Wp)
                 .reshape(2, 2, Cp, n_pad * hw))
    # Weight transposed + flattened tap-major / channel-minor: (Cout, 9*Cp).
    w_t = weight_hwio.reshape(KH * KW * Cp, Cout).T
    b_col = bias.reshape(Cout, 1)

    if compute_dtype is not None:                          # e.g. jnp.bfloat16 halves DMA bytes
        xk = xk.astype(compute_dtype)
        w_t = w_t.astype(compute_dtype)

    # Per-lane (h, w) coordinates for the 'same'-padding edge masks.  The pattern
    # is per-image periodic and tiles are image-aligned, so one tiny (1, Mb)
    # int32 array is shared by every grid step (constant index_map).
    Mb = nb * hw
    m = jnp.arange(Mb, dtype=jnp.int32)
    h_ids = ((m // Wp) % Hp).reshape(1, Mb)
    w_ids = (m % Wp).reshape(1, Mb)

    M = n_pad * hw
    grid = (M // Mb,)
    kernel = functools.partial(down_layer_kernel, Hp=Hp, Wp=Wp)

    out_t = pl.pallas_call(
        kernel,
        out_shape=jax.ShapeDtypeStruct((Cout, M), out_dtype),
        grid_spec=pltpu.PrefetchScalarGridSpec(
            num_scalar_prefetch=0,
            grid=grid,
            in_specs=[
                pl.BlockSpec((2, 2, Cp, Mb), lambda b: (0, 0, 0, b)),
                pl.BlockSpec((Cout, KH * KW * Cp), lambda b: (0, 0)),
                pl.BlockSpec((Cout, 1), lambda b: (0, 0)),
                pl.BlockSpec((1, Mb), lambda b: (0, 0)),
                pl.BlockSpec((1, Mb), lambda b: (0, 0)),
            ],
            out_specs=pl.BlockSpec((Cout, Mb), lambda b: (0, b)),
        ),
        compiler_params=pltpu.CompilerParams(
            # Batch-tile axis has no cross-step state -> parallel (v7x shards it
            # across its 2 TensorCores; harmless on v5e/v6e).
            dimension_semantics=("parallel",),
            # Working set is tiny at these tiles; 32 MiB leaves headroom for a
            # bigger Nb on v6e while staying well inside v7x's 64 MiB VMEM.
            vmem_limit_bytes=32 * 1024 * 1024,
        ),
    )(xk, w_t, b_col, h_ids, w_ids)

    # Undo the transpose / drop padded batch rows (pure layout).
    out = out_t.reshape(Cout, n_pad, Hp, Wp)[:, :N]
    return jnp.transpose(out, (1, 0, 2, 3))                # NCHW


def ref_down_layer(x_nchw, weight_hwio, bias):
    """Pure-JAX reference of DownLayer.forward (NCHW in / NCHW out)."""
    x = jnp.transpose(x_nchw, (0, 2, 3, 1))
    pooled = jax.lax.reduce_window(x, -jnp.inf, jax.lax.max,
                                   (1, 2, 2, 1), (1, 2, 2, 1), "VALID")
    y = jax.lax.conv_general_dilated(
        pooled, weight_hwio, window_strides=(1, 1), padding="SAME",
        dimension_numbers=("NHWC", "HWIO", "NHWC"))
    y = jax.nn.relu(y + bias)
    return jnp.transpose(y, (0, 3, 1, 2))


if __name__ == "__main__":
    key = jax.random.PRNGKey(0)
    k1, k2, k3 = jax.random.split(key, 3)

    N, Cin, Cout, H, W = 2, 4, 8, 16, 16
    # Synthetic deterministic params (Conv2d(in_ch=4, out_ch=8, k=3) shapes, HWIO).
    x = jax.random.normal(k1, (N, Cin, H, W), jnp.float32)
    w = jax.random.normal(k2, (3, 3, Cin, Cout), jnp.float32) * 0.1
    b = jax.random.normal(k3, (Cout,), jnp.float32) * 0.1

    out = jax.block_until_ready(down_layer(x, w, b))
    ref = jax.block_until_ready(ref_down_layer(x, w, b))

    assert out.shape == (N, Cout, H // 2, W // 2), out.shape
    assert jnp.allclose(out, ref, atol=1e-4, rtol=1e-4), "mismatch vs reference"
    print("KERNEL_OK")
</pallas_src>

<mosaic_0001>
module attributes {stable_mosaic.version = 11 : i64} {
  func.func @down_layer_kernel(%arg0: i32, %arg1: memref<2x2x8x128xf32, #tpu.memory_space<vmem>>, %arg2: memref<8x72xf32, #tpu.memory_space<vmem>>, %arg3: memref<8x1xf32, #tpu.memory_space<vmem>>, %arg4: memref<1x128xi32, #tpu.memory_space<vmem>>, %arg5: memref<1x128xi32, #tpu.memory_space<vmem>>, %arg6: memref<8x128xf32, #tpu.memory_space<vmem>>) attributes {dimension_semantics = [#tpu.dimension_semantics<parallel>], iteration_bounds = array<i64: 1>, scalar_prefetch = 0 : i64, scratch_operands = 0 : i64, tpu.core_type = #tpu.core_type<tc>, window_params = [{transform_indices = @transform_0, window_bounds = array<i64: 2, 2, 8, 128>}, {pipeline_mode = #tpu.pipeline_mode<synchronous>, transform_indices = @transform_1, window_bounds = array<i64: 8, 72>}, {pipeline_mode = #tpu.pipeline_mode<synchronous>, transform_indices = @transform_2, window_bounds = array<i64: 8, 1>}, {pipeline_mode = #tpu.pipeline_mode<synchronous>, transform_indices = @transform_3, window_bounds = array<i64: 1, 128>}, {pipeline_mode = #tpu.pipeline_mode<synchronous>, transform_indices = @transform_4, window_bounds = array<i64: 1, 128>}, {transform_indices = @transform_5, window_bounds = array<i64: 8, 128>}]} {
    %c0 = arith.constant 0 : index
    %c0_0 = arith.constant 0 : index
    %c0_1 = arith.constant 0 : index
    %c0_2 = arith.constant 0 : index
    %0 = vector.load %arg1[%c0, %c0_0, %c0_1, %c0_2] : memref<2x2x8x128xf32, #tpu.memory_space<vmem>>, vector<1x1x8x128xf32>
    %1 = vector.shape_cast %0 : vector<1x1x8x128xf32> to vector<8x128xf32>
    %c0_3 = arith.constant 0 : index
    %c1 = arith.constant 1 : index
    %c0_4 = arith.constant 0 : index
    %c0_5 = arith.constant 0 : index
    %2 = vector.load %arg1[%c0_3, %c1, %c0_4, %c0_5] : memref<2x2x8x128xf32, #tpu.memory_space<vmem>>, vector<1x1x8x128xf32>
    %3 = vector.shape_cast %2 : vector<1x1x8x128xf32> to vector<8x128xf32>
    %4 = arith.maximumf %1, %3 : vector<8x128xf32>
    %c1_6 = arith.constant 1 : index
    %c0_7 = arith.constant 0 : index
    %c0_8 = arith.constant 0 : index
    %c0_9 = arith.constant 0 : index
    %5 = vector.load %arg1[%c1_6, %c0_7, %c0_8, %c0_9] : memref<2x2x8x128xf32, #tpu.memory_space<vmem>>, vector<1x1x8x128xf32>
    %6 = vector.shape_cast %5 : vector<1x1x8x128xf32> to vector<8x128xf32>
    %c1_10 = arith.constant 1 : index
    %c1_11 = arith.constant 1 : index
    %c0_12 = arith.constant 0 : index
    %c0_13 = arith.constant 0 : index
    %7 = vector.load %arg1[%c1_10, %c1_11, %c0_12, %c0_13] : memref<2x2x8x128xf32, #tpu.memory_space<vmem>>, vector<1x1x8x128xf32>
    %8 = vector.shape_cast %7 : vector<1x1x8x128xf32> to vector<8x128xf32>
    %9 = arith.maximumf %6, %8 : vector<8x128xf32>
    %10 = arith.maximumf %4, %9 : vector<8x128xf32>
    %c0_14 = arith.constant 0 : index
    %c0_15 = arith.constant 0 : index
    %11 = vector.load %arg4[%c0_14, %c0_15] : memref<1x128xi32, #tpu.memory_space<vmem>>, vector<1x128xi32>
    %c0_16 = arith.constant 0 : index
    %c0_17 = arith.constant 0 : index
    %12 = vector.load %arg5[%c0_16, %c0_17] : memref<1x128xi32, #tpu.memory_space<vmem>>, vector<1x128xi32>
    %c9_i32 = arith.constant 9 : i32
    %13 = tpu.dynamic_rotate %10 by %c9_i32 dim 1 : vector<8x128xf32>, i32 -> vector<8x128xf32>
    %c-1_i32 = arith.constant -1 : i32
    %14 = vector.broadcast %c-1_i32 : i32 to vector<1x128xi32>
    %15 = arith.addi %11, %14 : vector<1x128xi32>
    %c0_i32 = arith.constant 0 : i32
    %16 = vector.broadcast %c0_i32 : i32 to vector<1x128xi32>
    %17 = arith.cmpi sge, %15, %16 : vector<1x128xi32>
    %c-1_i32_18 = arith.constant -1 : i32
    %18 = vector.broadcast %c-1_i32_18 : i32 to vector<1x128xi32>
    %19 = arith.addi %11, %18 : vector<1x128xi32>
    %c8_i32 = arith.constant 8 : i32
    %20 = vector.broadcast %c8_i32 : i32 to vector<1x128xi32>
    %21 = arith.cmpi slt, %19, %20 : vector<1x128xi32>
    %22 = arith.andi %17, %21 : vector<1x128xi1>
    %c-1_i32_19 = arith.constant -1 : i32
    %23 = vector.broadcast %c-1_i32_19 : i32 to vector<1x128xi32>
    %24 = arith.addi %12, %23 : vector<1x128xi32>
    %c0_i32_20 = arith.constant 0 : i32
    %25 = vector.broadcast %c0_i32_20 : i32 to vector<1x128xi32>
    %26 = arith.cmpi sge, %24, %25 : vector<1x128xi32>
    %27 = arith.andi %22, %26 : vector<1x128xi1>
    %c-1_i32_21 = arith.constant -1 : i32
    %28 = vector.broadcast %c-1_i32_21 : i32 to vector<1x128xi32>
    %29 = arith.addi %12, %28 : vector<1x128xi32>
    %c8_i32_22 = arith.constant 8 : i32
    %30 = vector.broadcast %c8_i32_22 : i32 to vector<1x128xi32>
    %31 = arith.cmpi slt, %29, %30 : vector<1x128xi32>
    %32 = arith.andi %27, %31 : vector<1x128xi1>
    %cst = arith.constant 0.000000e+00 : f32
    %33 = vector.broadcast %cst : f32 to vector<8x128xf32>
    %34 = vector.shape_cast %32 : vector<1x128xi1> to vector<1x128xi1>
    %35 = vector.broadcast %34 : vector<1x128xi1> to vector<8x128xi1>
    %36 = arith.select %35, %13, %33 : vector<8x128xi1>, vector<8x128xf32>
    %c8_i32_23 = arith.constant 8 : i32
    %37 = tpu.dynamic_rotate %10 by %c8_i32_23 dim 1 : vector<8x128xf32>, i32 -> vector<8x128xf32>
    %c-1_i32_24 = arith.constant -1 : i32
    %38 = vector.broadcast %c-1_i32_24 : i32 to vector<1x128xi32>
    %39 = arith.addi %11, %38 : vector<1x128xi32>
    %c0_i32_25 = arith.constant 0 : i32
    %40 = vector.broadcast %c0_i32_25 : i32 to vector<1x128xi32>
    %41 = arith.cmpi sge, %39, %40 : vector<1x128xi32>
    %c-1_i32_26 = arith.constant -1 : i32
    %42 = vector.broadcast %c-1_i32_26 : i32 to vector<1x128xi32>
    %43 = arith.addi %11, %42 : vector<1x128xi32>
    %c8_i32_27 = arith.constant 8 : i32
    %44 = vector.broadcast %c8_i32_27 : i32 to vector<1x128xi32>
    %45 = arith.cmpi slt, %43, %44 : vector<1x128xi32>
    %46 = arith.andi %41, %45 : vector<1x128xi1>
    %c0_i32_28 = arith.constant 0 : i32
    %47 = vector.broadcast %c0_i32_28 : i32 to vector<1x128xi32>
    %48 = arith.addi %12, %47 : vector<1x128xi32>
    %c0_i32_29 = arith.constant 0 : i32
    %49 = vector.broadcast %c0_i32_29 : i32 to vector<1x128xi32>
    %50 = arith.cmpi sge, %48, %49 : vector<1x128xi32>
    %51 = arith.andi %46, %50 : vector<1x128xi1>
    %c0_i32_30 = arith.constant 0 : i32
    %52 = vector.broadcast %c0_i32_30 : i32 to vector<1x128xi32>
    %53 = arith.addi %12, %52 : vector<1x128xi32>
    %c8_i32_31 = arith.constant 8 : i32
    %54 = vector.broadcast %c8_i32_31 : i32 to vector<1x128xi32>
    %55 = arith.cmpi slt, %53, %54 : vector<1x128xi32>
    %56 = arith.andi %51, %55 : vector<1x128xi1>
    %cst_32 = arith.constant 0.000000e+00 : f32
    %57 = vector.broadcast %cst_32 : f32 to vector<8x128xf32>
    %58 = vector.shape_cast %56 : vector<1x128xi1> to vector<1x128xi1>
    %59 = vector.broadcast %58 : vector<1x128xi1> to vector<8x128xi1>
    %60 = arith.select %59, %37, %57 : vector<8x128xi1>, vector<8x128xf32>
    %c7_i32 = arith.constant 7 : i32
    %61 = tpu.dynamic_rotate %10 by %c7_i32 dim 1 : vector<8x128xf32>, i32 -> vector<8x128xf32>
    %c-1_i32_33 = arith.constant -1 : i32
    %62 = vector.broadcast %c-1_i32_33 : i32 to vector<1x128xi32>
    %63 = arith.addi %11, %62 : vector<1x128xi32>
    %c0_i32_34 = arith.constant 0 : i32
    %64 = vector.broadcast %c0_i32_34 : i32 to vector<1x128xi32>
    %65 = arith.cmpi sge, %63, %64 : vector<1x128xi32>
    %c-1_i32_35 = arith.constant -1 : i32
    %66 = vector.broadcast %c-1_i32_35 : i32 to vector<1x128xi32>
    %67 = arith.addi %11, %66 : vector<1x128xi32>
    %c8_i32_36 = arith.constant 8 : i32
    %68 = vector.broadcast %c8_i32_36 : i32 to vector<1x128xi32>
    %69 = arith.cmpi slt, %67, %68 : vector<1x128xi32>
    %70 = arith.andi %65, %69 : vector<1x128xi1>
    %c1_i32 = arith.constant 1 : i32
    %71 = vector.broadcast %c1_i32 : i32 to vector<1x128xi32>
    %72 = arith.addi %12, %71 : vector<1x128xi32>
    %c0_i32_37 = arith.constant 0 : i32
    %73 = vector.broadcast %c0_i32_37 : i32 to vector<1x128xi32>
    %74 = arith.cmpi sge, %72, %73 : vector<1x128xi32>
    %75 = arith.andi %70, %74 : vector<1x128xi1>
    %c1_i32_38 = arith.constant 1 : i32
    %76 = vector.broadcast %c1_i32_38 : i32 to vector<1x128xi32>
    %77 = arith.addi %12, %76 : vector<1x128xi32>
    %c8_i32_39 = arith.constant 8 : i32
    %78 = vector.broadcast %c8_i32_39 : i32 to vector<1x128xi32>
    %79 = arith.cmpi slt, %77, %78 : vector<1x128xi32>
    %80 = arith.andi %75, %79 : vector<1x128xi1>
    %cst_40 = arith.constant 0.000000e+00 : f32
    %81 = vector.broadcast %cst_40 : f32 to vector<8x128xf32>
    %82 = vector.shape_cast %80 : vector<1x128xi1> to vector<1x128xi1>
    %83 = vector.broadcast %82 : vector<1x128xi1> to vector<8x128xi1>
    %84 = arith.select %83, %61, %81 : vector<8x128xi1>, vector<8x128xf32>
    %c1_i32_41 = arith.constant 1 : i32
    %85 = tpu.dynamic_rotate %10 by %c1_i32_41 dim 1 : vector<8x128xf32>, i32 -> vector<8x128xf32>
    %c0_i32_42 = arith.constant 0 : i32
    %86 = vector.broadcast %c0_i32_42 : i32 to vector<1x128xi32>
    %87 = arith.addi %11, %86 : vector<1x128xi32>
    %c0_i32_43 = arith.constant 0 : i32
    %88 = vector.broadcast %c0_i32_43 : i32 to vector<1x128xi32>
    %89 = arith.cmpi sge, %87, %88 : vector<1x128xi32>
    %c0_i32_44 = arith.constant 0 : i32
    %90 = vector.broadcast %c0_i32_44 : i32 to vector<1x128xi32>
    %91 = arith.addi %11, %90 : vector<1x128xi32>
    %c8_i32_45 = arith.constant 8 : i32
    %92 = vector.broadcast %c8_i32_45 : i32 to vector<1x128xi32>
    %93 = arith.cmpi slt, %91, %92 : vector<1x128xi32>
    %94 = arith.andi %89, %93 : vector<1x128xi1>
    %c-1_i32_46 = arith.constant -1 : i32
    %95 = vector.broadcast %c-1_i32_46 : i32 to vector<1x128xi32>
    %96 = arith.addi %12, %95 : vector<1x128xi32>
    %c0_i32_47 = arith.constant 0 : i32
    %97 = vector.broadcast %c0_i32_47 : i32 to vector<1x128xi32>
    %98 = arith.cmpi sge, %96, %97 : vector<1x128xi32>
    %99 = arith.andi %94, %98 : vector<1x128xi1>
    %c-1_i32_48 = arith.constant -1 : i32
    %100 = vector.broadcast %c-1_i32_48 : i32 to vector<1x128xi32>
    %101 = arith.addi %12, %100 : vector<1x128xi32>
    %c8_i32_49 = arith.constant 8 : i32
    %102 = vector.broadcast %c8_i32_49 : i32 to vector<1x128xi32>
    %103 = arith.cmpi slt, %101, %102 : vector<1x128xi32>
    %104 = arith.andi %99, %103 : vector<1x128xi1>
    %cst_50 = arith.constant 0.000000e+00 : f32
    %105 = vector.broadcast %cst_50 : f32 to vector<8x128xf32>
    %106 = vector.shape_cast %104 : vector<1x128xi1> to vector<1x128xi1>
    %107 = vector.broadcast %106 : vector<1x128xi1> to vector<8x128xi1>
    %108 = arith.select %107, %85, %105 : vector<8x128xi1>, vector<8x128xf32>
    %c127_i32 = arith.constant 127 : i32
    %109 = tpu.dynamic_rotate %10 by %c127_i32 dim 1 : vector<8x128xf32>, i32 -> vector<8x128xf32>
    %c0_i32_51 = arith.constant 0 : i32
    %110 = vector.broadcast %c0_i32_51 : i32 to vector<1x128xi32>
    %111 = arith.addi %11, %110 : vector<1x128xi32>
    %c0_i32_52 = arith.constant 0 : i32
    %112 = vector.broadcast %c0_i32_52 : i32 to vector<1x128xi32>
    %113 = arith.cmpi sge, %111, %112 : vector<1x128xi32>
    %c0_i32_53 = arith.constant 0 : i32
    %114 = vector.broadcast %c0_i32_53 : i32 to vector<1x128xi32>
    %115 = arith.addi %11, %114 : vector<1x128xi32>
    %c8_i32_54 = arith.constant 8 : i32
    %116 = vector.broadcast %c8_i32_54 : i32 to vector<1x128xi32>
    %117 = arith.cmpi slt, %115, %116 : vector<1x128xi32>
    %118 = arith.andi %113, %117 : vector<1x128xi1>
    %c1_i32_55 = arith.constant 1 : i32
    %119 = vector.broadcast %c1_i32_55 : i32 to vector<1x128xi32>
    %120 = arith.addi %12, %119 : vector<1x128xi32>
    %c0_i32_56 = arith.constant 0 : i32
    %121 = vector.broadcast %c0_i32_56 : i32 to vector<1x128xi32>
    %122 = arith.cmpi sge, %120, %121 : vector<1x128xi32>
    %123 = arith.andi %118, %122 : vector<1x128xi1>
    %c1_i32_57 = arith.constant 1 : i32
    %124 = vector.broadcast %c1_i32_57 : i32 to vector<1x128xi32>
    %125 = arith.addi %12, %124 : vector<1x128xi32>
    %c8_i32_58 = arith.constant 8 : i32
    %126 = vector.broadcast %c8_i32_58 : i32 to vector<1x128xi32>
    %127 = arith.cmpi slt, %125, %126 : vector<1x128xi32>
    %128 = arith.andi %123, %127 : vector<1x128xi1>
    %cst_59 = arith.constant 0.000000e+00 : f32
    %129 = vector.broadcast %cst_59 : f32 to vector<8x128xf32>
    %130 = vector.shape_cast %128 : vector<1x128xi1> to vector<1x128xi1>
    %131 = vector.broadcast %130 : vector<1x128xi1> to vector<8x128xi1>
    %132 = arith.select %131, %109, %129 : vector<8x128xi1>, vector<8x128xf32>
    %c121_i32 = arith.constant 121 : i32
    %133 = tpu.dynamic_rotate %10 by %c121_i32 dim 1 : vector<8x128xf32>, i32 -> vector<8x128xf32>
    %c1_i32_60 = arith.constant 1 : i32
    %134 = vector.broadcast %c1_i32_60 : i32 to vector<1x128xi32>
    %135 = arith.addi %11, %134 : vector<1x128xi32>
    %c0_i32_61 = arith.constant 0 : i32
    %136 = vector.broadcast %c0_i32_61 : i32 to vector<1x128xi32>
    %137 = arith.cmpi sge, %135, %136 : vector<1x128xi32>
    %c1_i32_62 = arith.constant 1 : i32
    %138 = vector.broadcast %c1_i32_62 : i32 to vector<1x128xi32>
    %139 = arith.addi %11, %138 : vector<1x128xi32>
    %c8_i32_63 = arith.constant 8 : i32
    %140 = vector.broadcast %c8_i32_63 : i32 to vector<1x128xi32>
    %141 = arith.cmpi slt, %139, %140 : vector<1x128xi32>
    %142 = arith.andi %137, %141 : vector<1x128xi1>
    %c-1_i32_64 = arith.constant -1 : i32
    %143 = vector.broadcast %c-1_i32_64 : i32 to vector<1x128xi32>
    %144 = arith.addi %12, %143 : vector<1x128xi32>
    %c0_i32_65 = arith.constant 0 : i32
    %145 = vector.broadcast %c0_i32_65 : i32 to vector<1x128xi32>
    %146 = arith.cmpi sge, %144, %145 : vector<1x128xi32>
    %147 = arith.andi %142, %146 : vector<1x128xi1>
    %c-1_i32_66 = arith.constant -1 : i32
    %148 = vector.broadcast %c-1_i32_66 : i32 to vector<1x128xi32>
    %149 = arith.addi %12, %148 : vector<1x128xi32>
    %c8_i32_67 = arith.constant 8 : i32
    %150 = vector.broadcast %c8_i32_67 : i32 to vector<1x128xi32>
    %151 = arith.cmpi slt, %149, %150 : vector<1x128xi32>
    %152 = arith.andi %147, %151 : vector<1x128xi1>
    %cst_68 = arith.constant 0.000000e+00 : f32
    %153 = vector.broadcast %cst_68 : f32 to vector<8x128xf32>
    %154 = vector.shape_cast %152 : vector<1x128xi1> to vector<1x128xi1>
    %155 = vector.broadcast %154 : vector<1x128xi1> to vector<8x128xi1>
    %156 = arith.select %155, %133, %153 : vector<8x128xi1>, vector<8x128xf32>
    %c120_i32 = arith.constant 120 : i32
    %157 = tpu.dynamic_rotate %10 by %c120_i32 dim 1 : vector<8x128xf32>, i32 -> vector<8x128xf32>
    %c1_i32_69 = arith.constant 1 : i32
    %158 = vector.broadcast %c1_i32_69 : i32 to vector<1x128xi32>
    %159 = arith.addi %11, %158 : vector<1x128xi32>
    %c0_i32_70 = arith.constant 0 : i32
    %160 = vector.broadcast %c0_i32_70 : i32 to vector<1x128xi32>
    %161 = arith.cmpi sge, %159, %160 : vector<1x128xi32>
    %c1_i32_71 = arith.constant 1 : i32
    %162 = vector.broadcast %c1_i32_71 : i32 to vector<1x128xi32>
    %163 = arith.addi %11, %162 : vector<1x128xi32>
    %c8_i32_72 = arith.constant 8 : i32
    %164 = vector.broadcast %c8_i32_72 : i32 to vector<1x128xi32>
    %165 = arith.cmpi slt, %163, %164 : vector<1x128xi32>
    %166 = arith.andi %161, %165 : vector<1x128xi1>
    %c0_i32_73 = arith.constant 0 : i32
    %167 = vector.broadcast %c0_i32_73 : i32 to vector<1x128xi32>
    %168 = arith.addi %12, %167 : vector<1x128xi32>
    %c0_i32_74 = arith.constant 0 : i32
    %169 = vector.broadcast %c0_i32_74 : i32 to vector<1x128xi32>
    %170 = arith.cmpi sge, %168, %169 : vector<1x128xi32>
    %171 = arith.andi %166, %170 : vector<1x128xi1>
    %c0_i32_75 = arith.constant 0 : i32
    %172 = vector.broadcast %c0_i32_75 : i32 to vector<1x128xi32>
    %173 = arith.addi %12, %172 : vector<1x128xi32>
    %c8_i32_76 = arith.constant 8 : i32
    %174 = vector.broadcast %c8_i32_76 : i32 to vector<1x128xi32>
    %175 = arith.cmpi slt, %173, %174 : vector<1x128xi32>
    %176 = arith.andi %171, %175 : vector<1x128xi1>
    %cst_77 = arith.constant 0.000000e+00 : f32
    %177 = vector.broadcast %cst_77 : f32 to vector<8x128xf32>
    %178 = vector.shape_cast %176 : vector<1x128xi1> to vector<1x128xi1>
    %179 = vector.broadcast %178 : vector<1x128xi1> to vector<8x128xi1>
    %180 = arith.select %179, %157, %177 : vector<8x128xi1>, vector<8x128xf32>
    %c119_i32 = arith.constant 119 : i32
    %181 = tpu.dynamic_rotate %10 by %c119_i32 dim 1 : vector<8x128xf32>, i32 -> vector<8x128xf32>
    %c1_i32_78 = arith.constant 1 : i32
    %182 = vector.broadcast %c1_i32_78 : i32 to vector<1x128xi32>
    %183 = arith.addi %11, %182 : vector<1x128xi32>
    %c0_i32_79 = arith.constant 0 : i32
    %184 = vector.broadcast %c0_i32_79 : i32 to vector<1x128xi32>
    %185 = arith.cmpi sge, %183, %184 : vector<1x128xi32>
    %c1_i32_80 = arith.constant 1 : i32
    %186 = vector.broadcast %c1_i32_80 : i32 to vector<1x128xi32>
    %187 = arith.addi %11, %186 : vector<1x128xi32>
    %c8_i32_81 = arith.constant 8 : i32
    %188 = vector.broadcast %c8_i32_81 : i32 to vector<1x128xi32>
    %189 = arith.cmpi slt, %187, %188 : vector<1x128xi32>
    %190 = arith.andi %185, %189 : vector<1x128xi1>
    %c1_i32_82 = arith.constant 1 : i32
    %191 = vector.broadcast %c1_i32_82 : i32 to vector<1x128xi32>
    %192 = arith.addi %12, %191 : vector<1x128xi32>
    %c0_i32_83 = arith.constant 0 : i32
    %193 = vector.broadcast %c0_i32_83 : i32 to vector<1x128xi32>
    %194 = arith.cmpi sge, %192, %193 : vector<1x128xi32>
    %195 = arith.andi %190, %194 : vector<1x128xi1>
    %c1_i32_84 = arith.constant 1 : i32
    %196 = vector.broadcast %c1_i32_84 : i32 to vector<1x128xi32>
    %197 = arith.addi %12, %196 : vector<1x128xi32>
    %c8_i32_85 = arith.constant 8 : i32
    %198 = vector.broadcast %c8_i32_85 : i32 to vector<1x128xi32>
    %199 = arith.cmpi slt, %197, %198 : vector<1x128xi32>
    %200 = arith.andi %195, %199 : vector<1x128xi1>
    %cst_86 = arith.constant 0.000000e+00 : f32
    %201 = vector.broadcast %cst_86 : f32 to vector<8x128xf32>
    %202 = vector.shape_cast %200 : vector<1x128xi1> to vector<1x128xi1>
    %203 = vector.broadcast %202 : vector<1x128xi1> to vector<8x128xi1>
    %204 = arith.select %203, %181, %201 : vector<8x128xi1>, vector<8x128xf32>
    %205 = tpu.concatenate %36, %60, %84, %108, %10, %132, %156, %180, %204 in 0 : vector<8x128xf32>, vector<8x128xf32>, vector<8x128xf32>, vector<8x128xf32>, vector<8x128xf32>, vector<8x128xf32>, vector<8x128xf32>, vector<8x128xf32>, vector<8x128xf32> -> vector<72x128xf32>
    %c0_87 = arith.constant 0 : index
    %c0_88 = arith.constant 0 : index
    %206 = vector.load %arg2[%c0_87, %c0_88] : memref<8x72xf32, #tpu.memory_space<vmem>>, vector<8x72xf32>
    %cst_89 = arith.constant dense<0.000000e+00> : vector<8x128xf32>
    %207 = tpu.matmul %206, %205, %cst_89 {dimension_numbers = #tpu.dot_dimension_numbers<[1], [0], [0], [1], [0, 0, 1, 1], [], []>} : vector<8x72xf32>, vector<72x128xf32>, vector<8x128xf32> -> vector<8x128xf32>
    %c0_90 = arith.constant 0 : index
    %c0_91 = arith.constant 0 : index
    %208 = vector.load %arg3[%c0_90, %c0_91] : memref<8x1xf32, #tpu.memory_space<vmem>>, vector<8x1xf32>
    %209 = vector.broadcast %208 : vector<8x1xf32> to vector<8x128xf32>
    %210 = arith.addf %207, %209 : vector<8x128xf32>
    %cst_92 = arith.constant 0.000000e+00 : f32
    %211 = vector.broadcast %cst_92 : f32 to vector<8x128xf32>
    %212 = arith.maximumf %210, %211 : vector<8x128xf32>
    %c0_93 = arith.constant 0 : index
    %c0_94 = arith.constant 0 : index
    %213 = vector.load %arg6[%c0_93, %c0_94] : memref<8x128xf32, #tpu.memory_space<vmem>>, vector<8x128xf32>
    tpu.vector_store %arg6[%c0_93, %c0_94], %212 {strides = array<i32>} : memref<8x128xf32, #tpu.memory_space<vmem>>, vector<8x128xf32>,
    return
  }
  func.func @transform_0(%arg0: i32) -> (i32, i32, i32, i32) {
    %c0_i32 = arith.constant 0 : i32
    %c0_i32_0 = arith.constant 0 : i32
    %c0_i32_1 = arith.constant 0 : i32
    %c0_i32_2 = arith.constant 0 : i32
    return %c0_i32, %c0_i32_0, %c0_i32_1, %arg0 : i32, i32, i32, i32
  }
  func.func @transform_1(%arg0: i32) -> (i32, i32) {
    %c0_i32 = arith.constant 0 : i32
    %c0_i32_0 = arith.constant 0 : i32
    %c0_i32_1 = arith.constant 0 : i32
    return %c0_i32, %c0_i32_0 : i32, i32
  }
  func.func @transform_2(%arg0: i32) -> (i32, i32) {
    %c0_i32 = arith.constant 0 : i32
    %c0_i32_0 = arith.constant 0 : i32
    %c0_i32_1 = arith.constant 0 : i32
    return %c0_i32, %c0_i32_0 : i32, i32
  }
  func.func @transform_3(%arg0: i32) -> (i32, i32) {
    %c0_i32 = arith.constant 0 : i32
    %c0_i32_0 = arith.constant 0 : i32
    %c0_i32_1 = arith.constant 0 : i32
    return %c0_i32, %c0_i32_0 : i32, i32
  }
  func.func @transform_4(%arg0: i32) -> (i32, i32) {
    %c0_i32 = arith.constant 0 : i32
    %c0_i32_0 = arith.constant 0 : i32
    %c0_i32_1 = arith.constant 0 : i32
    return %c0_i32, %c0_i32_0 : i32, i32
  }
  func.func @transform_5(%arg0: i32) -> (i32, i32) {
    %c0_i32 = arith.constant 0 : i32
    %c0_i32_0 = arith.constant 0 : i32
    return %c0_i32, %arg0 : i32, i32
  }
}

</mosaic_0001>

<bundles_post_ra>
// kernel: tpu_custom_call.1
= control target key start
LH: loop header
LB: loop body
LE: loop exit
PB: predicated region body
PF: predicated region fallthrough
CT: control target
= control target key end

     0   :  { %10 = vsyncpa [#allocation3], 0  ;;  %s382_s0 = inlined_call_operand.hbm [shape: f32[2,2,8,128], index: 0, kind: input, shape index: {}]   ;;  %s383_s1 = inlined_call_operand.vmem [shape: f32[8,72], index: 1, kind: input, shape index: {}]   ;;  %s384_s2 = inlined_call_operand.vmem [shape: f32[8,1], index: 2, kind: input, shape index: {}]   ;;  %s385_s3 = inlined_call_operand.vmem [shape: s32[1,128], index: 3, kind: input, shape index: {}]   ;;  %s386_s4 = inlined_call_operand.vmem [shape: s32[1,128], index: 4, kind: input, shape index: {}]   ;;  %s387_s5 = inlined_call_operand.hbm [shape: f32[8,128], index: 5, kind: output, shape index: {}]  }
   0x1   :  { %11 = vsyncpa [#allocation4], 0  ;;  %s16_s20 = sshll.u32 %s382_s0, 4  ;;  %s257_s21 = smov [#allocation2]   ;;  %s17_s20 = int_to_ptr.hbm [resolvable:$true] %s16_s20 }
   0x2   :  { %s18_s22 = sshll.u32 %s257_s21, 4  ;;  %s258_s23 = smov 128   ;;  %s19_s22 = int_to_ptr.vmem [resolvable:$true] %s18_s22 }
   0x3   :  { %s259_s24 = smov 8  }
   0x4   :  { %24 = dma.hbm_to_vmem [thread:$0]  %s17_s20, 512, %s19_s22, [#allocation3], %s258_s23, %s258_s23, %s259_s24  }
   0x5   :  { %253 = dma.done.wait [#allocation3], 512  }
   0x6   :  { %254 = vsyncadd [#allocation3], 4294966784  ;;  %v37_v0 = vld [vmem:[#allocation2] sm:$0xff]  ;;  %v39_v1 = vld [vmem:[#allocation2 + $0x8] sm:$0xff]  ;;  %s260_s25 = smov 119   ;;  %s261_s0 = smov 121  }
   0x7   :  { %v42_v2 = vld [vmem:[#allocation2 + $0x10] sm:$0xff]  ;;  %v40_v3 = vmax.f32 %v37_v0, %v39_v1  ;;  %v44_v4 = vld [vmem:[#allocation2 + $0x18] sm:$0xff]  ;;  %s262_s26 = smov 1   ;;  %s263_s27 = smov 120   ;;  %v267_v7 = vmov 0   ;;  %v133_v15 = vld [vmem:[%s384_s2] sm:$0xff] }
   0x8   :  { %v45_v5 = vmax.f32 %v42_v2, %v44_v4  ;;  %s264_s28 = smov 127   ;;  %s265_s29 = smov 7   ;;  %203 = vset.pattern.permute.xlu2 %v267_v7  ;;  %204 = vset.pattern.permute.xlu0 %v267_v7  ;;  %v47_v8 = vld [vmem:[%s385_s3] sm:$0x1] }
   0x9   :  { %s266_s30 = smov 9   ;;  %v48_v9 = vld [vmem:[%s386_s4] sm:$0x1]  ;;  %v106_v10 = vadd.s32 1, %v47_v8  ;;  %vm87_vm8 = vcmp.ge.s32.totalorder %v47_v8, 0  ;;  %vm88_vm9 = vcmp.lt.s32.totalorder %v47_v8, 8 }
   0xa   :  { %v302_v6 = vmax.f32 %v40_v3, %v45_v5  ;;  %v76_v11 = vadd.s32 1, %v48_v9  ;;  %vm388_vm7 = vcmp.ge.s32.totalorder %v48_v9, 0  ;;  %v55_v13 = vadd.s32 4294967295, %v48_v9  ;;  %vm335_vm13 = vmand %vm87_vm8, %vm88_vm9  ;;  %v132_v42 = vld [vmem:[%s383_s1] sm:$0xff]  ;;  %s268_s11 = smov [#allocation5]   ;;  %s172_s15 = sshll.u32 %s387_s5, 4  ;;  %s173_s15 = int_to_ptr.hbm [resolvable:$true] %s172_s15 }
   0xb   :  { %vm107_vm0 = vcmp.ge.s32.totalorder %v106_v10, 0  ;;  %vm108_vm1 = vcmp.lt.s32.totalorder %v106_v10, 8  ;;  %vm68_vm10 = vcmp.lt.s32.totalorder %v48_v9, 8  ;;  %v51_v17 = vadd.s32 4294967295, %v47_v8  ;;  %s170_s12 = sshll.u32 %s268_s11, 4  ;;  %s171_s12 = int_to_ptr.vmem [resolvable:$true] %s170_s12 }
   0xc   :  { %124 = vrot.lane.b32.xlu0 %v302_v6, %s260_s25  ;;  %104 = vrot.lane.b32.xlu1 %v302_v6, %s261_s0  ;;  %vm77_vm2 = vcmp.ge.s32.totalorder %v76_v11, 0  ;;  %vm320_vm3 = vmand %vm107_vm0, %vm108_vm1  ;;  %vm79_vm4 = vcmp.lt.s32.totalorder %v76_v11, 8  ;;  %vm56_vm12 = vcmp.ge.s32.totalorder %v55_v13, 0  ;;  %vm58_vm15 = vcmp.lt.s32.totalorder %v55_v13, 8 }
   0xd   :  { %85 = vrot.lane.b32.xlu2 %v302_v6, %s262_s26  ;;  %vm126_vm5 = vmand %vm320_vm3, %vm77_vm2 }
   0xe   :  { %vm127_vm6 = vmand %vm126_vm5, %vm79_vm4  ;;  %vm52_vm5 = vcmp.ge.s32.totalorder %v51_v17, 0 }
   0xf   :  { %v128_v14 = vsel %vm127_vm6, 1, %v267_v7  ;;  %vm118_vm11 = vmand %vm320_vm3, %vm388_vm7  ;;  %vm53_vm6 = vcmp.lt.s32.totalorder %v51_v17, 8 }
  0x10   :  { %v129_v18 = vperm.slane %v128_v14, 0  ;;  %vm119_vm14 = vmand %vm118_vm11, %vm68_vm10 }
  0x11   :  { %vm110_vm0 = vmand %vm320_vm3, %vm56_vm12  ;;  %v120_v19 = vsel %vm119_vm14, 1, %v267_v7 }
  0x12   :  { %vm98_vm1 = vmand %vm335_vm13, %vm77_vm2  ;;  %vm130_vm8 = vcmp.eq.s32.totalorder %v129_v18, 1  ;;  %v121_v24 = vperm.slane %v120_v19, 0 }
  0x13   :  { %vm111_vm9 = vmand %vm110_vm0, %vm58_vm15 }
  0x14   :  { %116 = vrot.lane.b32.xlu0 %v302_v6, %s263_s27  ;;  %96 = vrot.lane.b32.xlu1 %v302_v6, %s264_s28  ;;  %vm99_vm7 = vmand %vm98_vm1, %vm79_vm4  ;;  %v112_v23 = vsel %vm111_vm9, 1, %v267_v7  ;;  %vm395_vm1 = vcmp.ge.s32.totalorder %v48_v9, 0 }
  0x15   :  { %74 = vrot.lane.b32.xlu2 %v302_v6, %s265_s29  ;;  %vm349_vm11 = vmand %vm52_vm5, %vm53_vm6  ;;  %v100_v25 = vsel %vm99_vm7, 1, %v267_v7  ;;  %v113_v26 = vperm.slane %v112_v23, 0  ;;  %vm122_vm6 = vcmp.eq.s32.totalorder %v121_v24, 1 }
  0x16   :  { %vm90_vm3 = vmand %vm335_vm13, %vm56_vm12  ;;  %v101_v28 = vperm.slane %v100_v25, 0 }
  0x17   :  { %vm78_vm14 = vmand %vm349_vm11, %vm77_vm2  ;;  %vm114_vm2 = vcmp.eq.s32.totalorder %v113_v26, 1 }
  0x18   :  { %vm91_vm0 = vmand %vm90_vm3, %vm58_vm15  ;;  %vm102_vm9 = vcmp.eq.s32.totalorder %v101_v28, 1 }
  0x19   :  { %vm67_vm5 = vmand %vm349_vm11, %vm395_vm1  ;;  %v92_v29 = vsel %vm91_vm0, 1, %v267_v7 }
  0x1a   :  { %vm57_vm7 = vmand %vm349_vm11, %vm56_vm12  ;;  %v93_v33 = vperm.slane %v92_v29, 0  ;;  %vm139_vm11 = vcmask 588800  }
  0x1b   :  { %vm69_vm13 = vmand %vm67_vm5, %vm68_vm10 }
  0x1c   :  { %64 = vrot.lane.b32.xlu0 %v302_v6, %s259_s24  ;;  %49 = vrot.lane.b32.xlu1 %v302_v6, %s266_s30  ;;  %vm59_vm3 = vmand %vm57_vm7, %vm58_vm15  ;;  %v70_v34 = vsel %vm69_vm13, 1, %v267_v7 }
  0x1d   :  { %136 = vperm.xlu2 %203, %v133_v15   ;;  %v60_v36 = vsel %vm59_vm3, 1, %v267_v7  ;;  %v71_v37 = vperm.slane %v70_v34, 0 }
  0x1e   :  { %v61_v39 = vperm.slane %v60_v36, 0 }
  0x1f   :  { %vm72_vm12 = vcmp.eq.s32.totalorder %v71_v37, 1 }
  0x20   :  { %vm62_vm15 = vcmp.eq.s32.totalorder %v61_v39, 1 }
  0x67   :  { %v86_v27 = vpop.permute.xlu2 %85 }
  0x6f   :  { %v75_v38 = vpop.permute.xlu2 %74 }
  0x77   :  { %v137_v43 = vpop.permute.xlu2 %136 }
  0x7e   :  { %v125_v20 = vpop.permute.xlu0 %124  ;;  %v105_v21 = vpop.permute.xlu1 %104 }
  0x7f   :  { %182 = vmatpush.msk.msra.mxu0 %vm130_vm8, %v125_v20  ;;  %vm80_vm8 = vmand %vm78_vm14, %vm79_vm4  ;;  %vm94_vm4 = vcmp.eq.s32.totalorder %v93_v33, 1 }
  0x80   :  { %v81_v31 = vsel %vm80_vm8, 1, %v267_v7 }
  0x81   :  { %v82_v35 = vperm.slane %v81_v31, 0 }
  0x83   :  { %vm83_vm10 = vcmp.eq.s32.totalorder %v82_v35, 1 }
  0x86   :  { %v117_v30 = vpop.permute.xlu0 %116  ;;  %v97_v32 = vpop.permute.xlu1 %96 }
  0x87   :  { %183 = vmatpush.msk.msra.mxu0 %vm122_vm6, %v117_v30 }
  0x89   :  { %184 = vmatpush.msk.msra.mxu0 %vm114_vm2, %v105_v21 }
  0x8b   :  { %185 = vmatpush.msk.msra.mxu0 %vm102_vm9, %v97_v32 }
  0x8d   :  { %154 = vmatpush.msra.mxu0 %v302_v6 }
  0x8e   :  { %v65_v40 = vpop.permute.xlu0 %64  ;;  %v50_v41 = vpop.permute.xlu1 %49 }
  0x8f   :  { %186 = vmatpush.msk.msra.mxu0 %vm94_vm4, %v86_v27 }
  0x91   :  { %187 = vmatpush.msk.msra.mxu0 %vm83_vm10, %v75_v38 }
  0x93   :  { %188 = vmatpush.msk.msra.mxu0 %vm72_vm12, %v65_v40 }
  0x95   :  { %189 = vmatpush.msk.msra.mxu0 %vm62_vm15, %v50_v41 }
  0x96   :  { %190 = vmatmul.msk.f32.vlgmr.msra.gmra.mxu0 %vm139_vm11, %v132_v42 }
 0x113   :  { %v160_v44 = vpop.f32.mrf.mxu0 }
 0x114   :  { %v161_v45 = vadd.f32 %v160_v44, %v137_v43 }
 0x116   :  { %v163_v46 = vmax.f32 %v161_v45, 0.0 }
 0x118   :  { %164 = vst [vmem:[#allocation5] sm:$0xff] %v163_v46 }
 0x119   :  { %175 = dma.vmem_to_hbm [thread:$0]  %s171_s12, 128, %s173_s15, [#allocation4]  }
 0x11a   :  { %255 = dma.done.wait [#allocation4], 128  }
 0x11b   :  { %256 = vsyncadd [#allocation4], 4294967168 }
 0x11c   :  { %180 = vsyncpa [#allocation3], 1 }
 0x11d   :  { %181 = vsyncpa [#allocation4], 1 }

</bundles_post_ra>
